<compile_context>
chip_gen: v7x
topology: tpu7x:2x2x1
jax: 0.10.0
libtpu: 0.0.40
codegen_flags: <defaults>
</compile_context>

<pallas_src>
import functools

import jax
import jax.numpy as jnp
import numpy as np
from jax.experimental import pallas as pl
from jax.experimental.pallas import tpu as pltpu

GN_EPS = 1e-5


def _deconv_gn_relu_kernel(cols_ref, w_ref, gamma_ref, beta_ref, o_ref, *,
                           groups, rows_per_group, inv_cnt):
    """One batch sample per grid step.

    cols_ref : (1, R2, HW)   shared phase-patch matrix (bf16), R2 = taps*Cin
    w_ref    : (Rows, R2)    stacked phase weights (bf16), Rows = s^2 * Cout,
                             row index = o*s^2 + phase
    gamma_ref: (Rows, 1)     GN scale, repeated per phase (f32)
    beta_ref : (Rows, 1)     GN shift, repeated per phase (f32)
    o_ref    : (1, Rows, HW) phase-major output, lane-dense (HW on lanes)
    """
    cols = cols_ref[0]                                      # (R2, HW) bf16
    w = w_ref[...]                                          # (Rows, R2) bf16

    # One lane-dense MXU matmul per sample covering all output phases:
    # bf16 operands, f32 accumulation.
    y = jnp.dot(w, cols, preferred_element_type=jnp.float32)    # (Rows, HW) f32

    # GN statistics: single lane-reduction pass over the whole tile (sum and
    # sum of squares), then tiny per-group sublane sums on (Rows, 1) vectors.
    s1 = jnp.sum(y, axis=1, keepdims=True)                  # (Rows, 1)
    s2 = jnp.sum(y * y, axis=1, keepdims=True)              # (Rows, 1)

    gamma = gamma_ref[...]                                  # (Rows, 1) f32, read once
    beta = beta_ref[...]

    scales, shifts = [], []
    for g in range(groups):                                 # static & tiny -> unrolled
        r0, r1 = g * rows_per_group, (g + 1) * rows_per_group
        mean = jnp.sum(s1[r0:r1, :], keepdims=True) * inv_cnt    # (1, 1)
        ex2 = jnp.sum(s2[r0:r1, :], keepdims=True) * inv_cnt     # (1, 1)
        var = jnp.maximum(ex2 - mean * mean, 0.0)
        # TODO(synk): switch to a centered two-pass variance if production
        # sizes/tolerances make the E[x^2]-E[x]^2 cancellation an issue.
        inv = jax.lax.rsqrt(var + GN_EPS)
        sc = gamma[r0:r1, :] * inv                          # fold GN affine into
        scales.append(sc)                                   # per-row scale/shift
        shifts.append(beta[r0:r1, :] - mean * sc)
    scale = jnp.concatenate(scales, axis=0)                 # (Rows, 1)
    shift = jnp.concatenate(shifts, axis=0)

    # GN + ReLU: 2 VPU ops/elem (+ relu/cast), one unmasked full-tile store.
    o_ref[0, :, :] = jnp.maximum(y * scale + shift, 0.0).astype(o_ref.dtype)


def deconv2d_gn_relu(x, w_t, gamma, beta, *, stride=2, group_channel=8):
    """x: (N, Cin, H, W); w_t: (Cin, Cout, K, K) (PyTorch ConvTranspose2d layout)."""
    N, Cin, H, W = x.shape
    _, Cout, K, _ = w_t.shape
    assert stride in (1, 2)
    assert stride == 1 or K >= 2          # crop-to-(2H,2W) formula needs K >= stride

    s2 = stride * stride
    # Per-phase output extent. For stride 2 the module crops to 2H x 2W, so
    # each of the 4 phases contributes exactly an (H, W) grid of pixels.
    Ho = H if stride == 2 else H + K - 1
    Wo = W if stride == 2 else W + K - 1
    HW = Ho * Wo
    Dh = (K - 1) // stride + 1            # taps per phase along H (max over phases)
    Dw = (K - 1) // stride + 1
    R2 = Dh * Dw * Cin
    Rows = Cout * s2

    G = max(1, Cout // group_channel)
    assert Cout % G == 0
    cpg = Cout // G
    rows_per_group = cpg * s2             # one GN group = cpg channels x s^2 phases

    # ---- wrapper-side layout plumbing (no conv FLOPs, no zero dilation) ----
    # Phase decomposition: out[o, s*a+p, s*b+q] =
    #     sum_{c,dh,dw} x[c, a-dh, b-dw] * w[c, o, s*dh+p, s*dw+q]
    # All phases share the same (taps*Cin, Ho*Wo) patch matrix.
    pad = ((0, 0), (0, 0), (Dh - 1, Ho - H), (Dw - 1, Wo - W))
    x_pd = jnp.pad(x, pad)                                      # (N, Cin, Ho+Dh-1, Wo+Dw-1)
    patches = [x_pd[:, :, Dh - 1 - dh:Dh - 1 - dh + Ho, Dw - 1 - dw:Dw - 1 - dw + Wo]
               for dh in range(Dh) for dw in range(Dw)]
    # TODO(synk): for production resolutions, extract these taps inside the
    # kernel from a halo'd (Cin, Ht+Dh-1, Wt+Dw-1) input block on a spatially
    # tiled grid (with cross-tile GN accumulation, axis marked "arbitrary"),
    # so even this ceil(K/s)^2-fold patch matrix never touches HBM and the
    # per-step block fits v7x's 64 MiB VMEM.
    cols = jnp.stack(patches, axis=1).reshape(N, R2, HW).astype(jnp.bfloat16)

    # Stacked phase weights, channel-major rows:
    #   w_all[o*s2 + p*s + q, (dh*Dw+dw)*Cin + c] = w_t[c, o, s*dh+p, s*dw+q]
    # (zero where s*dh+p >= K or s*dw+q >= K).
    phase_ws = []
    for p in range(stride):
        for q_ in range(stride):
            taps = []
            for dh in range(Dh):
                for dw in range(Dw):
                    kh, kw = stride * dh + p, stride * dw + q_
                    if kh < K and kw < K:
                        taps.append(jnp.transpose(w_t[:, :, kh, kw]))   # (Cout, Cin)
                    else:
                        taps.append(jnp.zeros((Cout, Cin), w_t.dtype))
            phase_ws.append(jnp.concatenate(taps, axis=1))              # (Cout, R2)
    w_all = jnp.stack(phase_ws, axis=1).reshape(Rows, R2).astype(jnp.bfloat16)

    g_rows = jnp.repeat(gamma.astype(jnp.float32), s2).reshape(Rows, 1)
    b_rows = jnp.repeat(beta.astype(jnp.float32), s2).reshape(Rows, 1)

    kernel = functools.partial(_deconv_gn_relu_kernel, groups=G,
                               rows_per_group=rows_per_group,
                               inv_cnt=1.0 / float(rows_per_group * HW))

    y_flat = pl.pallas_call(
        kernel,
        out_shape=jax.ShapeDtypeStruct((N, Rows, HW), x.dtype),
        grid_spec=pltpu.PrefetchScalarGridSpec(
            num_scalar_prefetch=0,
            grid=(N,),
            in_specs=[
                pl.BlockSpec((1, R2, HW), lambda n: (n, 0, 0)),
                pl.BlockSpec((Rows, R2), lambda n: (0, 0)),
                pl.BlockSpec((Rows, 1), lambda n: (0, 0)),
                pl.BlockSpec((Rows, 1), lambda n: (0, 0)),
            ],
            out_specs=pl.BlockSpec((1, Rows, HW), lambda n: (n, 0, 0)),
        ),
        compiler_params=pltpu.CompilerParams(
            dimension_semantics=("parallel",),     # samples are independent
            vmem_limit_bytes=32 * 1024 * 1024,     # tiny tiles here; re-derive
                                                   # per-generation once the
                                                   # spatial tiling is added
        ),
    )(cols, w_all, g_rows, b_rows)

    # Phase interleave (pure layout plumbing, once, outside the kernel):
    #   y_flat[n, o*s2 + p*s + q, a*Wo + b] -> out[n, o, s*a+p, s*b+q]
    out = y_flat.reshape(N, Cout, stride, stride, Ho, Wo)
    out = out.transpose(0, 1, 4, 2, 5, 3).reshape(N, Cout, Ho * stride, Wo * stride)
    return out


def reference(x, w_t, gamma, beta, stride, group_channel=8):
    """Pure-JAX reference with identical semantics (direct scatter definition)."""
    N, Cin, H, W = x.shape
    _, Cout, K, _ = w_t.shape
    Hf, Wf = (H - 1) * stride + K, (W - 1) * stride + K
    y = jnp.zeros((N, Cout, Hf, Wf), jnp.float32)
    for kh in range(K):
        for kw in range(K):
            contrib = jnp.einsum('ncij,co->noij',
                                 x.astype(jnp.float32),
                                 w_t[:, :, kh, kw].astype(jnp.float32),
                                 precision=jax.lax.Precision.HIGHEST)
            y = y.at[:, :, kh:kh + (H - 1) * stride + 1:stride,
                           kw:kw + (W - 1) * stride + 1:stride].add(contrib)
    if stride == 2:
        y = y[:, :, :2 * H, :2 * W]
    G = max(1, Cout // group_channel)
    Nn, C, Hh, Ww = y.shape
    yg = y.reshape(Nn, G, C // G, Hh, Ww)
    mean = jnp.mean(yg, axis=(2, 3, 4), keepdims=True)
    var = jnp.mean((yg - mean) ** 2, axis=(2, 3, 4), keepdims=True)
    yn = ((yg - mean) * jax.lax.rsqrt(var + GN_EPS)).reshape(Nn, C, Hh, Ww)
    out = yn * gamma.reshape(1, C, 1, 1) + beta.reshape(1, C, 1, 1)
    return jnp.maximum(out, 0.0)


if __name__ == "__main__":
    def q(a):
        # Snap values to the bf16 grid (kept as f32) so the bf16-operand MXU
        # path and the f32 XLA reference agree tightly.
        return a.astype(jnp.bfloat16).astype(jnp.float32)

    def make_case(key, N, Cin, Cout, H, W, K):
        kx, kw, kg, kb = jax.random.split(key, 4)
        x = q(jax.random.normal(kx, (N, Cin, H, W), dtype=jnp.float32))
        bound = 1.0 / np.sqrt(Cin * K * K)          # init_uniform-style weights
        w_t = q(jax.random.uniform(kw, (Cin, Cout, K, K), dtype=jnp.float32,
                                   minval=-bound, maxval=bound))
        gamma = q(1.0 + 0.1 * jax.random.normal(kg, (Cout,), dtype=jnp.float32))
        beta = q(0.1 * jax.random.normal(kb, (Cout,), dtype=jnp.float32))
        return x, w_t, gamma, beta

    # Deconv2d_gn(in=8, out=16, kernel_size=3, stride=2, gn=True, group_channel=8)
    N, Cin, Cout, H, W, K = 2, 8, 16, 16, 16, 3
    x, w_t, gamma, beta = make_case(jax.random.PRNGKey(0), N, Cin, Cout, H, W, K)
    out = jax.block_until_ready(
        deconv2d_gn_relu(x, w_t, gamma, beta, stride=2, group_channel=8))
    ref = jax.block_until_ready(reference(x, w_t, gamma, beta, 2, 8))
    assert out.shape == (N, Cout, 2 * H, 2 * W), out.shape
    assert ref.shape == out.shape, (ref.shape, out.shape)
    assert np.allclose(np.asarray(out), np.asarray(ref), atol=3e-4, rtol=3e-4)

    # stride=1 path (single phase, no crop) as an extra sanity check.
    x1, w1, g1, b1 = make_case(jax.random.PRNGKey(1), 2, 8, 16, 8, 8, 3)
    out1 = jax.block_until_ready(
        deconv2d_gn_relu(x1, w1, g1, b1, stride=1, group_channel=8))
    ref1 = jax.block_until_ready(reference(x1, w1, g1, b1, 1, 8))
    assert out1.shape == ref1.shape == (2, 16, 10, 10), out1.shape
    assert np.allclose(np.asarray(out1), np.asarray(ref1), atol=3e-4, rtol=3e-4)

    print("KERNEL_OK")
</pallas_src>

<mosaic_0001>
module attributes {stable_mosaic.version = 11 : i64} {
  func.func @_deconv_gn_relu_kernel(%arg0: i32, %arg1: memref<1x32x256xbf16, #tpu.memory_space<vmem>>, %arg2: memref<64x32xbf16, #tpu.memory_space<vmem>>, %arg3: memref<64x1xf32, #tpu.memory_space<vmem>>, %arg4: memref<64x1xf32, #tpu.memory_space<vmem>>, %arg5: memref<1x64x256xf32, #tpu.memory_space<vmem>>) attributes {dimension_semantics = [#tpu.dimension_semantics<parallel>], iteration_bounds = array<i64: 2>, scalar_prefetch = 0 : i64, scratch_operands = 0 : i64, tpu.core_type = #tpu.core_type<tc>, window_params = [{transform_indices = @transform_0, window_bounds = array<i64: 1, 32, 256>}, {pipeline_mode = #tpu.pipeline_mode<synchronous>, transform_indices = @transform_1, window_bounds = array<i64: 64, 32>}, {pipeline_mode = #tpu.pipeline_mode<synchronous>, transform_indices = @transform_2, window_bounds = array<i64: 64, 1>}, {pipeline_mode = #tpu.pipeline_mode<synchronous>, transform_indices = @transform_3, window_bounds = array<i64: 64, 1>}, {transform_indices = @transform_4, window_bounds = array<i64: 1, 64, 256>}]} {
    %c0 = arith.constant 0 : index
    %c0_0 = arith.constant 0 : index
    %c0_1 = arith.constant 0 : index
    %0 = vector.load %arg1[%c0, %c0_0, %c0_1] : memref<1x32x256xbf16, #tpu.memory_space<vmem>>, vector<1x32x256xbf16>
    %1 = vector.shape_cast %0 : vector<1x32x256xbf16> to vector<32x256xbf16>
    %c0_2 = arith.constant 0 : index
    %c0_3 = arith.constant 0 : index
    %2 = vector.load %arg2[%c0_2, %c0_3] : memref<64x32xbf16, #tpu.memory_space<vmem>>, vector<64x32xbf16>
    %cst = arith.constant dense<0.000000e+00> : vector<64x256xf32>
    %3 = tpu.matmul %2, %1, %cst {dimension_numbers = #tpu.dot_dimension_numbers<[1], [0], [0], [1], [0, 0, 1, 1], [], []>} : vector<64x32xbf16>, vector<32x256xbf16>, vector<64x256xf32> -> vector<64x256xf32>
    %cst_4 = arith.constant dense<0.000000e+00> : vector<64xf32>
    %4 = vector.multi_reduction <add>, %3, %cst_4 [1] : vector<64x256xf32> to vector<64xf32>
    %5 = vector.shape_cast %4 : vector<64xf32> to vector<64x1xf32>
    %6 = arith.mulf %3, %3 : vector<64x256xf32>
    %cst_5 = arith.constant dense<0.000000e+00> : vector<64xf32>
    %7 = vector.multi_reduction <add>, %6, %cst_5 [1] : vector<64x256xf32> to vector<64xf32>
    %8 = vector.shape_cast %7 : vector<64xf32> to vector<64x1xf32>
    %c0_6 = arith.constant 0 : index
    %c0_7 = arith.constant 0 : index
    %9 = vector.load %arg3[%c0_6, %c0_7] : memref<64x1xf32, #tpu.memory_space<vmem>>, vector<64x1xf32>
    %c0_8 = arith.constant 0 : index
    %c0_9 = arith.constant 0 : index
    %10 = vector.load %arg4[%c0_8, %c0_9] : memref<64x1xf32, #tpu.memory_space<vmem>>, vector<64x1xf32>
    %11 = vector.extract_strided_slice %5 {offsets = [0, 0], sizes = [32, 1], strides = [1, 1]} : vector<64x1xf32> to vector<32x1xf32>
    %12 = vector.shape_cast %11 : vector<32x1xf32> to vector<1x32x1xf32>
    %cst_10 = arith.constant dense<0.000000e+00> : vector<1xf32>
    %13 = vector.multi_reduction <add>, %12, %cst_10 [1, 2] : vector<1x32x1xf32> to vector<1xf32>
    %14 = vector.shape_cast %13 : vector<1xf32> to vector<1x1x1xf32>
    %15 = vector.extract %14[0, 0, 0] : f32 from vector<1x1x1xf32>
    %16 = vector.broadcast %15 : f32 to vector<1x1xf32>
    %cst_11 = arith.constant 1.22070313E-4 : f32
    %17 = vector.broadcast %cst_11 : f32 to vector<1x1xf32>
    %18 = arith.mulf %16, %17 : vector<1x1xf32>
    %19 = vector.extract_strided_slice %8 {offsets = [0, 0], sizes = [32, 1], strides = [1, 1]} : vector<64x1xf32> to vector<32x1xf32>
    %20 = vector.shape_cast %19 : vector<32x1xf32> to vector<1x32x1xf32>
    %cst_12 = arith.constant dense<0.000000e+00> : vector<1xf32>
    %21 = vector.multi_reduction <add>, %20, %cst_12 [1, 2] : vector<1x32x1xf32> to vector<1xf32>
    %22 = vector.shape_cast %21 : vector<1xf32> to vector<1x1x1xf32>
    %23 = vector.extract %22[0, 0, 0] : f32 from vector<1x1x1xf32>
    %24 = vector.broadcast %23 : f32 to vector<1x1xf32>
    %cst_13 = arith.constant 1.22070313E-4 : f32
    %25 = vector.broadcast %cst_13 : f32 to vector<1x1xf32>
    %26 = arith.mulf %24, %25 : vector<1x1xf32>
    %27 = arith.mulf %18, %18 : vector<1x1xf32>
    %28 = arith.subf %26, %27 : vector<1x1xf32>
    %cst_14 = arith.constant 0.000000e+00 : f32
    %29 = vector.broadcast %cst_14 : f32 to vector<1x1xf32>
    %30 = arith.maximumf %28, %29 : vector<1x1xf32>
    %cst_15 = arith.constant 9.99999974E-6 : f32
    %31 = vector.broadcast %cst_15 : f32 to vector<1x1xf32>
    %32 = arith.addf %30, %31 : vector<1x1xf32>
    %33 = math.rsqrt %32 : vector<1x1xf32>
    %34 = vector.extract_strided_slice %9 {offsets = [0, 0], sizes = [32, 1], strides = [1, 1]} : vector<64x1xf32> to vector<32x1xf32>
    %35 = vector.broadcast %33 : vector<1x1xf32> to vector<32x1xf32>
    %36 = arith.mulf %34, %35 : vector<32x1xf32>
    %37 = vector.extract_strided_slice %10 {offsets = [0, 0], sizes = [32, 1], strides = [1, 1]} : vector<64x1xf32> to vector<32x1xf32>
    %38 = vector.broadcast %18 : vector<1x1xf32> to vector<32x1xf32>
    %39 = arith.mulf %38, %36 : vector<32x1xf32>
    %40 = arith.subf %37, %39 : vector<32x1xf32>
    %41 = vector.extract_strided_slice %5 {offsets = [32, 0], sizes = [32, 1], strides = [1, 1]} : vector<64x1xf32> to vector<32x1xf32>
    %42 = vector.shape_cast %41 : vector<32x1xf32> to vector<1x32x1xf32>
    %cst_16 = arith.constant dense<0.000000e+00> : vector<1xf32>
    %43 = vector.multi_reduction <add>, %42, %cst_16 [1, 2] : vector<1x32x1xf32> to vector<1xf32>
    %44 = vector.shape_cast %43 : vector<1xf32> to vector<1x1x1xf32>
    %45 = vector.extract %44[0, 0, 0] : f32 from vector<1x1x1xf32>
    %46 = vector.broadcast %45 : f32 to vector<1x1xf32>
    %cst_17 = arith.constant 1.22070313E-4 : f32
    %47 = vector.broadcast %cst_17 : f32 to vector<1x1xf32>
    %48 = arith.mulf %46, %47 : vector<1x1xf32>
    %49 = vector.extract_strided_slice %8 {offsets = [32, 0], sizes = [32, 1], strides = [1, 1]} : vector<64x1xf32> to vector<32x1xf32>
    %50 = vector.shape_cast %49 : vector<32x1xf32> to vector<1x32x1xf32>
    %cst_18 = arith.constant dense<0.000000e+00> : vector<1xf32>
    %51 = vector.multi_reduction <add>, %50, %cst_18 [1, 2] : vector<1x32x1xf32> to vector<1xf32>
    %52 = vector.shape_cast %51 : vector<1xf32> to vector<1x1x1xf32>
    %53 = vector.extract %52[0, 0, 0] : f32 from vector<1x1x1xf32>
    %54 = vector.broadcast %53 : f32 to vector<1x1xf32>
    %cst_19 = arith.constant 1.22070313E-4 : f32
    %55 = vector.broadcast %cst_19 : f32 to vector<1x1xf32>
    %56 = arith.mulf %54, %55 : vector<1x1xf32>
    %57 = arith.mulf %48, %48 : vector<1x1xf32>
    %58 = arith.subf %56, %57 : vector<1x1xf32>
    %cst_20 = arith.constant 0.000000e+00 : f32
    %59 = vector.broadcast %cst_20 : f32 to vector<1x1xf32>
    %60 = arith.maximumf %58, %59 : vector<1x1xf32>
    %cst_21 = arith.constant 9.99999974E-6 : f32
    %61 = vector.broadcast %cst_21 : f32 to vector<1x1xf32>
    %62 = arith.addf %60, %61 : vector<1x1xf32>
    %63 = math.rsqrt %62 : vector<1x1xf32>
    %64 = vector.extract_strided_slice %9 {offsets = [32, 0], sizes = [32, 1], strides = [1, 1]} : vector<64x1xf32> to vector<32x1xf32>
    %65 = vector.broadcast %63 : vector<1x1xf32> to vector<32x1xf32>
    %66 = arith.mulf %64, %65 : vector<32x1xf32>
    %67 = vector.extract_strided_slice %10 {offsets = [32, 0], sizes = [32, 1], strides = [1, 1]} : vector<64x1xf32> to vector<32x1xf32>
    %68 = vector.broadcast %48 : vector<1x1xf32> to vector<32x1xf32>
    %69 = arith.mulf %68, %66 : vector<32x1xf32>
    %70 = arith.subf %67, %69 : vector<32x1xf32>
    %71 = tpu.concatenate %36, %66 in 0 : vector<32x1xf32>, vector<32x1xf32> -> vector<64x1xf32>
    %72 = tpu.concatenate %40, %70 in 0 : vector<32x1xf32>, vector<32x1xf32> -> vector<64x1xf32>
    %73 = vector.broadcast %71 : vector<64x1xf32> to vector<64x256xf32>
    %74 = arith.mulf %3, %73 : vector<64x256xf32>
    %75 = vector.broadcast %72 : vector<64x1xf32> to vector<64x256xf32>
    %76 = arith.addf %74, %75 : vector<64x256xf32>
    %cst_22 = arith.constant 0.000000e+00 : f32
    %77 = vector.broadcast %cst_22 : f32 to vector<64x256xf32>
    %78 = arith.maximumf %76, %77 : vector<64x256xf32>
    %c0_23 = arith.constant 0 : index
    %c0_24 = arith.constant 0 : index
    %c0_25 = arith.constant 0 : index
    %79 = vector.load %arg5[%c0_23, %c0_24, %c0_25] : memref<1x64x256xf32, #tpu.memory_space<vmem>>, vector<1x64x256xf32>
    %80 = vector.shape_cast %79 : vector<1x64x256xf32> to vector<64x256xf32>
    %81 = vector.shape_cast %78 : vector<64x256xf32> to vector<1x64x256xf32>
    tpu.vector_store %arg5[%c0_23, %c0_24, %c0_25], %81 {strides = array<i32>} : memref<1x64x256xf32, #tpu.memory_space<vmem>>, vector<1x64x256xf32>,
    return
  }
  func.func @transform_0(%arg0: i32) -> (i32, i32, i32) {
    %c0_i32 = arith.constant 0 : i32
    %c0_i32_0 = arith.constant 0 : i32
    %c0_i32_1 = arith.constant 0 : i32
    return %arg0, %c0_i32, %c0_i32_0 : i32, i32, i32
  }
  func.func @transform_1(%arg0: i32) -> (i32, i32) {
    %c0_i32 = arith.constant 0 : i32
    %c0_i32_0 = arith.constant 0 : i32
    %c0_i32_1 = arith.constant 0 : i32
    return %c0_i32, %c0_i32_0 : i32, i32
  }
  func.func @transform_2(%arg0: i32) -> (i32, i32) {
    %c0_i32 = arith.constant 0 : i32
    %c0_i32_0 = arith.constant 0 : i32
    %c0_i32_1 = arith.constant 0 : i32
    return %c0_i32, %c0_i32_0 : i32, i32
  }
  func.func @transform_3(%arg0: i32) -> (i32, i32) {
    %c0_i32 = arith.constant 0 : i32
    %c0_i32_0 = arith.constant 0 : i32
    %c0_i32_1 = arith.constant 0 : i32
    return %c0_i32, %c0_i32_0 : i32, i32
  }
  func.func @transform_4(%arg0: i32) -> (i32, i32, i32) {
    %c0_i32 = arith.constant 0 : i32
    %c0_i32_0 = arith.constant 0 : i32
    %c0_i32_1 = arith.constant 0 : i32
    return %arg0, %c0_i32, %c0_i32_0 : i32, i32, i32
  }
}

</mosaic_0001>

<bundles_post_ra>
// kernel: tpu_custom_call.1
= control target key start
LH: loop header
LB: loop body
LE: loop exit
PB: predicated region body
PF: predicated region fallthrough
CT: control target
= control target key end

     0   :  { %9 = vsyncpa [#allocation3], 0  ;;  %s1245_s0 = inlined_call_operand.vmem [shape: bf16[2,32,256], index: 0, kind: input, shape index: {}]   ;;  %s1246_s1 = inlined_call_operand.vmem [shape: bf16[64,32], index: 1, kind: input, shape index: {}]   ;;  %s1247_s2 = inlined_call_operand.vmem [shape: f32[64,1], index: 2, kind: input, shape index: {}]   ;;  %s1248_s3 = inlined_call_operand.vmem [shape: f32[64,1], index: 3, kind: input, shape index: {}]   ;;  %s1249_s4 = inlined_call_operand.hbm [shape: f32[2,64,256], index: 4, kind: output, shape index: {}]  }
   0x1   :  { %11 = vsyncpa [#allocation3 + $0x1], 0  ;;  %s931_s15 = smov 0   ;;  %s933_s16 = smov 0  }
   0x2   :  { %s935_s17 = smov 0   ;;  %s937_s18 = smov 0  }
   0x3 LB: > { %s952_s19 = sadd.s32 4294967295, %s900_s18   ;;  %s742_s20 = sadd.s32 4294967294, %s900_s18   ;;  %s900_s18 = sphi %s937_s18, %s1255_s18   ;;  %s896_s17 = sphi %s935_s17, %s1254_s17   ;;  %s892_s16 = sphi %s933_s16, %s1253_s16   ;;  %s888_s15 = sphi %s931_s15, %s1252_s15  }
   0x4   : > { %s956_s21 = sadd.s32 1, %s900_s18   ;;  %s113_s22 = sadd.s32 1, %s896_s17 }
   0x5   : > { %s110_s23 = ssub.s32 %s900_s18, %s956_s21  ;;  %p123_p0 = scmp.ne.s32.totalorder %s896_s17, %s892_s16 }
   0x6   : > { %p111_p1 = scmp.eq.s32.totalorder %s110_s23, 0  ;;  %p124_p2 = scmp.eq.s32.totalorder %s952_s19, 1 }
   0x7   : > { %p129_p3 = scmp.ne.s32.totalorder %s892_s16, %s888_s15  ;;  %p130_p4 = scmp.eq.s32.totalorder %s742_s20, 1 }
   0x8   : > { %s967_s24 = scalar_select %p111_p1, %s896_s17, %s113_s22  }
   0x9   : > { %p969_p5 = por %p124_p2, %p123_p0  ;;  %p973_p6 = por %p130_p4, %p129_p3 }
   0xa   : > { %p745_p7 = scmp.ge.s32.totalorder %s900_s18, 1  ;;  %p165_p8 = scmp.lt.s32.totalorder %s900_s18, 3 }
   0xc   : > { %p166_p9 = pnand %p745_p7, %p165_p8 }
   0xd   : > { %p191_p10 = scmp.lt.s32.totalorder (!%p166_p9), %s952_s19, 1  ;;  %v902_v0 = vmov (!%p166_p9), 0   ;;  %v830_v5 = vld [vmem:[%s1246_s1] sm:$0xff] (!%p166_p9)   ;;  %v831_v6 = vld [vmem:[%s1246_s1 + $0x10] sm:$0xff] (!%p166_p9)   ;;  %vm249_vm0 = vcmask (!%p166_p9), 261120   ;;  %v832_v7 = vld [vmem:[%s1246_s1 + $0x18] sm:$0xff] (!%p166_p9)  }
   0xe   : > { %169 = sbr.rel (%p166_p9) target bundleno = 831 (0x33f), region = 36  ;;  %294 = vmatprep.mubr.bf16.mxu0 (!%p166_p9), %v902_v0  ;;  %314 = vmatprep.mubr.bf16.mxu1 (!%p166_p9), %v902_v0  ;;  %v833_v8 = vld [vmem:[%s1246_s1 + $0x8] sm:$0xff] (!%p166_p9)   ;;  %vm415_vm1 = vcmask (!%p166_p9), 7168   ;;  %s903_s8 = smov (!%p166_p9), [#allocation2]  }
   0xf   : > { %823 = vset.pattern.permute.xlu1 (!%p166_p9), %v902_v0  ;;  %822 = vset.pattern.permute.xlu0 (!%p166_p9), %v902_v0  ;;  %s842_s9 = sshll.u32 (!%p166_p9), %s903_s8, 4  ;;  %s843_s9 = int_to_ptr.vmem [resolvable:$false] %s842_s9 }
  0x10   : > { %s844_s10 = scalar_lea.vmem (!%p166_p9), %s843_s9, 4096 }
  0x15   : > { %s192_s27 = scalar_select %p191_p10, %s952_s19, 1 }
  0x17   : > { %s766_s28 = sshll.u32 %s192_s27, 5 }
  0x18   : > { %s195_s5 = scalar_lea.vmem %s1245_s0, %s766_s28  ;;  %s767_s28 = sshll.u32 %s952_s19, 11 }
  0x19   : > { %v824_v1 = vld [vmem:[%s195_s5 + $0x4] ss:$8 sps:$4 sm:$0xff]   ;;  %v826_v2 = vld [vmem:[%s195_s5] ss:$8 sps:$4 sm:$0xff]   ;;  %v827_v3 = vld [vmem:[%s195_s5 + $0x14] ss:$8 sps:$4 sm:$0xff]   ;;  %s1196_s6 = scalar_lea.hbm %s1249_s4, %s767_s28 }
  0x1a   : > { %262 = vmatprep.subr.bf16.mxu0 %v824_v1  ;;  %768 = vmatprep.subr.bf16.mxu1 %v824_v1  ;;  %v829_v4 = vld [vmem:[%s195_s5 + $0x10] ss:$8 sps:$4 sm:$0xff]  }
  0x1b   : > { %263 = vmatpush1.bf16.msra.mxu0 %v826_v2  ;;  %770 = vmatpush1.bf16.msra.mxu1 %v826_v2 }
  0x1c   : > { %264 = vmatprep.subr.bf16.mxu0 %v827_v3  ;;  %769 = vmatprep.subr.bf16.mxu1 %v827_v3 }
  0x1f   : > { %265 = vmatpush1.bf16.msra.mxu0 %v829_v4  ;;  %771 = vmatpush1.bf16.msra.mxu1 %v829_v4 }
  0x22   : > { %757 = vmatmul.mubr.msk.bf16.vlgmr.msra.gmra.mrb[0].mxu0 %vm249_vm0, %v830_v5  ;;  %759 = vmatmul.mubr.msk.bf16.vlgmr.msra.gmra.mrb[0].mxu1 %vm249_vm0, %v831_v6 }
  0x23   : > { %324 = vmatprep.mubr.bf16.mxu1 %v902_v0  ;;  %304 = vmatprep.mubr.bf16.mxu0 %v902_v0 }
  0x2a   : > { %760 = vmatmul.mubr.msk.bf16.gmra.mrb[4].mxu1 %vm249_vm0, %v832_v7  ;;  %758 = vmatmul.mubr.msk.bf16.gmra.mrb[4].mxu0 %vm249_vm0, %v833_v8 }
  0xf5   : > { %v996_v9 = vpop.f32.mrb[0].mxu0  ;;  %v998_v10 = vpop.f32.mrb[0].mxu1 }
  0xf6   : > { %v1000_v11 = vpop.f32.mrb[1].mxu0  ;;  %v1002_v12 = vpop.f32.mrb[1].mxu1  ;;  %v367_v13 = vmul.f32 %v998_v10, %v998_v10  ;;  %v359_v14 = vmul.f32 %v996_v9, %v996_v9 }
  0xf7   : > { %v1008_v15 = vpop.f32.mrb[2].mxu0  ;;  %v1010_v16 = vpop.f32.mrb[2].mxu1  ;;  %v347_v17 = vadd.f32 %v1002_v12, %v998_v10  ;;  %v335_v18 = vadd.f32 %v1000_v11, %v996_v9  ;;  %v368_v19 = vmul.f32 %v1002_v12, %v1002_v12  ;;  %v360_v20 = vmul.f32 %v1000_v11, %v1000_v11 }
  0xf8   : > { %v1020_v21 = vpop.f32.mrb[3].mxu0  ;;  %v1022_v22 = vpop.f32.mrb[3].mxu1  ;;  %v361_v23 = vmul.f32 %v1008_v15, %v1008_v15  ;;  %v369_v24 = vmul.f32 %v1010_v16, %v1010_v16 }
  0xf9   : > { %348 = vadd.xlane.f32.xlu1 %v347_v17  ;;  %336 = vadd.xlane.f32.xlu0 %v335_v18  ;;  %v350_v25 = vadd.f32 %v1022_v22, %v1010_v16  ;;  %v338_v26 = vadd.f32 %v1020_v21, %v1008_v15  ;;  %v387_v27 = vadd.f32 %v368_v19, %v367_v13 }
  0xfa   : > { %v375_v28 = vadd.f32 %v360_v20, %v359_v14  ;;  %v362_v29 = vmul.f32 %v1020_v21, %v1020_v21  ;;  %v370_v30 = vmul.f32 %v1022_v22, %v1022_v22 }
  0xfc   : > { %v378_v31 = vadd.f32 %v362_v29, %v361_v23  ;;  %v390_v32 = vadd.f32 %v370_v30, %v369_v24 }
  0xfd   : > { %351 = vadd.xlane.f32.xlu1 %v350_v25  ;;  %339 = vadd.xlane.f32.xlu0 %v338_v26  ;;  %v1036_v33 = vpop.f32.mrb[4].mxu1  ;;  %v1038_v34 = vpop.f32.mrb[4].mxu0 }
  0xfe   : > { %v1040_v35 = vpop.f32.mrb[5].mxu1  ;;  %v1042_v36 = vpop.f32.mrb[5].mxu0  ;;  %v363_v37 = vmul.f32 %v1038_v34, %v1038_v34  ;;  %v371_v38 = vmul.f32 %v1036_v33, %v1036_v33 }
  0xff   : > { %v1048_v39 = vpop.f32.mrb[6].mxu1  ;;  %v1050_v40 = vpop.f32.mrb[6].mxu0  ;;  %v353_v41 = vadd.f32 %v1040_v35, %v1036_v33  ;;  %v341_v42 = vadd.f32 %v1042_v36, %v1038_v34  ;;  %v364_v43 = vmul.f32 %v1042_v36, %v1042_v36  ;;  %v372_v44 = vmul.f32 %v1040_v35, %v1040_v35 }
 0x100   : > { %v1060_v45 = vpop.f32.mrb[7].mxu1  ;;  %v1062_v46 = vpop.f32.mrb[7].mxu0  ;;  %v365_v47 = vmul.f32 %v1050_v40, %v1050_v40  ;;  %v373_v48 = vmul.f32 %v1048_v39, %v1048_v39 }
 0x101   : > { %388 = vadd.xlane.f32.xlu1 %v387_v27  ;;  %376 = vadd.xlane.f32.xlu0 %v375_v28  ;;  %v374_v49 = vmul.f32 %v1060_v45, %v1060_v45  ;;  %v366_v50 = vmul.f32 %v1062_v46, %v1062_v46  ;;  %v381_v51 = vadd.f32 %v364_v43, %v363_v37 }
 0x102   : > { %v344_v52 = vadd.f32 %v1062_v46, %v1050_v40  ;;  %v356_v53 = vadd.f32 %v1060_v45, %v1048_v39  ;;  %v393_v54 = vadd.f32 %v372_v44, %v371_v38 }
 0x103   : > { %v384_v55 = vadd.f32 %v366_v50, %v365_v47  ;;  %v396_v56 = vadd.f32 %v374_v49, %v373_v48 }
 0x105   : > { %379 = vadd.xlane.f32.xlu1 %v378_v31  ;;  %391 = vadd.xlane.f32.xlu0 %v390_v32 }
 0x109   : > { %354 = vadd.xlane.f32.xlu1 %v353_v41  ;;  %342 = vadd.xlane.f32.xlu0 %v341_v42 }
 0x10d   : > { %382 = vadd.xlane.f32.xlu0 %v381_v51  ;;  %345 = vadd.xlane.f32.xlu1 %v344_v52 }
 0x111   : > { %357 = vadd.xlane.f32.xlu0 %v356_v53  ;;  %385 = vadd.xlane.f32.xlu1 %v384_v55 }
 0x115   : > { %394 = vadd.xlane.f32.xlu0 %v393_v54  ;;  %397 = vadd.xlane.f32.xlu1 %v396_v56 }
 0x186   : > { %v349_v57 = vpop.xlane.xlu1 %348  ;;  %v337_v58 = vpop.xlane.xlu0 %336 }
 0x187   : > { %v416_v4 = vsel %vm415_vm1, %v337_v58, 0.0  ;;  %v469_v13 = vsel %vm415_vm1, %v349_v57, 0.0 }
 0x18a   : > { %v352_v59 = vpop.xlane.xlu1 %351  ;;  %v340_v60 = vpop.xlane.xlu0 %339 }
 0x18b   : > { %v417_v1 = vsel %vm415_vm1, %v340_v60, 0.0  ;;  %v470_v7 = vsel %vm415_vm1, %v352_v59, 0.0 }
 0x18c   : > { %v418_v6 = vadd.f32 %v417_v1, %v416_v4  ;;  %v471_v25 = vadd.f32 %v470_v7, %v469_v13 }
 0x18e   : > { %v389_v61 = vpop.xlane.xlu1 %388  ;;  %v377_v62 = vpop.xlane.xlu0 %376 }
 0x18f   : > { %v434_v19 = vsel %vm415_vm1, %v377_v62, 0.0  ;;  %v487_v43 = vsel %vm415_vm1, %v389_v61, 0.0 }
 0x192   : > { %v380_v63 = vpop.xlane.xlu1 %379  ;;  %v392_v0 = vpop.xlane.xlu0 %391 }
 0x193   : > { %v435_v8 = vsel %vm415_vm1, %v380_v63, 0.0  ;;  %v488_v32 = vsel %vm415_vm1, %v392_v0, 0.0 }
 0x194   : > { %v436_v26 = vadd.f32 %v435_v8, %v434_v19  ;;  %v489_v44 = vadd.f32 %v488_v32, %v487_v43 }
 0x196   : > { %v355_v2 = vpop.xlane.xlu1 %354  ;;  %v343_v3 = vpop.xlane.xlu0 %342 }
 0x197   : > { %v419_v5 = vsel %vm415_vm1, %v343_v3, 0.0  ;;  %v472_v20 = vsel %vm415_vm1, %v355_v2, 0.0 }
 0x198   : > { %v420_v14 = vadd.f32 %v419_v5, %v418_v6  ;;  %v473_v28 = vadd.f32 %v472_v20, %v471_v25 }
 0x19a   : > { %v383_v17 = vpop.xlane.xlu0 %382  ;;  %v346_v18 = vpop.xlane.xlu1 %345 }
 0x19b   : > { %v437_v23 = vsel %vm415_vm1, %v383_v17, 0.0  ;;  %v421_v24 = vsel %vm415_vm1, %v346_v18, 0.0 }
 0x19c   : > { %v422_v27 = vadd.f32 %v421_v24, %v420_v14  ;;  %v438_v29 = vadd.f32 %v437_v23, %v436_v26 }
 0x19e   : > { %v358_v30 = vpop.xlane.xlu0 %357  ;;  %423 = vadd.xlane.f32.xlu0 %v422_v27  ;;  %v386_v31 = vpop.xlane.xlu1 %385 }
 0x19f   : > { %v474_v37 = vsel %vm415_vm1, %v358_v30, 0.0  ;;  %v439_v38 = vsel %vm415_vm1, %v386_v31, 0.0 }
 0x1a0   : > { %v475_v41 = vadd.f32 %v474_v37, %v473_v28  ;;  %v440_v42 = vadd.f32 %v439_v38, %v438_v29 }
 0x1a2   : > { %v395_v47 = vpop.xlane.xlu0 %394  ;;  %476 = vadd.xlane.f32.xlu0 %v475_v41  ;;  %441 = vadd.xlane.f32.xlu1 %v440_v42  ;;  %v398_v48 = vpop.xlane.xlu1 %397 }
 0x1a3   : > { %v490_v49 = vsel %vm415_vm1, %v395_v47, 0.0  ;;  %v492_v51 = vsel %vm415_vm1, %v398_v48, 0.0 }
 0x1a4   : > { %v491_v50 = vadd.f32 %v490_v49, %v489_v44  ;;  %v400_v49 = vld [vmem:[%s1247_s2 + $0x8] sm:$0xff] }
 0x1a6   : > { %v493_v52 = vadd.f32 %v492_v51, %v491_v50  ;;  %v399_v50 = vld [vmem:[%s1247_s2] sm:$0xff]  ;;  %v402_v51 = vld [vmem:[%s1247_s2 + $0x18] sm:$0xff] }
 0x1a8   : > { %494 = vadd.xlane.f32.xlu1 %v493_v52 }
 0x22b   : > { %v424_v53 = vpop.xlane.xlu0 %423 }
 0x22c   : > { %v425_v54 = vrot.slane %v424_v53, 4 }
 0x22e   : > { %v426_v55 = vadd.f32 %v425_v54, %v424_v53 }
 0x22f   : > { %v477_v56 = vpop.xlane.xlu0 %476  ;;  %v442_v57 = vpop.xlane.xlu1 %441 }
 0x230   : > { %v427_v58 = vrot.slane %v426_v55, 2  ;;  %v478_v59 = vrot.slane %v477_v56, 4  ;;  %v443_v60 = vrot.slane %v442_v57, 4 }
 0x232   : > { %v479_v61 = vadd.f32 %v478_v59, %v477_v56  ;;  %v444_v62 = vadd.f32 %v443_v60, %v442_v57  ;;  %v428_v63 = vadd.f32 %v427_v58, %v426_v55  ;;  %v401_v56 = vld [vmem:[%s1247_s2 + $0x10] sm:$0xff]  ;;  %v408_v57 = vld [vmem:[%s1248_s3 + $0x8] sm:$0xff] }
 0x233   : > { %v404_v59 = vld [vmem:[%s1247_s2 + $0x28] sm:$0xff] }
 0x234   : > { %v480_v0 = vrot.slane %v479_v61, 2  ;;  %v445_v1 = vrot.slane %v444_v62, 2  ;;  %v429_v2 = vrot.slane %v428_v63, 1 }
 0x235   : > { %v495_v3 = vpop.xlane.xlu1 %494 }
 0x236   : > { %v496_v4 = vrot.slane %v495_v3, 4  ;;  %v430_v5 = vadd.f32 %v429_v2, %v428_v63  ;;  %v446_v6 = vadd.f32 %v445_v1, %v444_v62  ;;  %v481_v7 = vadd.f32 %v480_v0, %v479_v61  ;;  %v410_v0 = vld [vmem:[%s1248_s3 + $0x18] sm:$0xff] }
 0x237   : > { %v406_v1 = vld [vmem:[%s1247_s2 + $0x38] sm:$0xff] }
 0x238   : > { %v497_v8 = vadd.f32 %v496_v4, %v495_v3  ;;  %772 = vpush %v430_v5  ;;  %v447_v13 = vrot.slane %v446_v6, 1  ;;  %v482_v14 = vrot.slane %v481_v7, 1 }
 0x23a   : > { %v498_v17 = vrot.slane %v497_v8, 2  ;;  %v448_v18 = vadd.f32 %v447_v13, %v446_v6  ;;  %v483_v19 = vadd.f32 %v482_v14, %v481_v7  ;;  %v412_v6 = vld [vmem:[%s1248_s3 + $0x28] sm:$0xff]  ;;  %v403_v7 = vld [vmem:[%s1247_s2 + $0x20] sm:$0xff] }
 0x23c   : > { %774 = vpush %v448_v18  ;;  %v499_v20 = vadd.f32 %v498_v17, %v497_v8  ;;  %v414_v17 = vld [vmem:[%s1248_s3 + $0x38] sm:$0xff] }
 0x23d   : > { %776 = vpush %v483_v19  ;;  %v405_v19 = vld [vmem:[%s1247_s2 + $0x30] sm:$0xff] }
 0x23e   : > { %v500_v23 = vrot.slane %v499_v20, 1 }
 0x240   : > { %v501_v24 = vadd.f32 %v500_v23, %v499_v20 }
 0x242   : > { %778 = vpush %v501_v24  ;;  %v407_v24 = vld [vmem:[%s1248_s3] sm:$0xff] }
 0x269   : > { %s773_s14 = spop %772 }
 0x26a   : > { %v432_v25 = vstv %s773_s14 }
 0x26b   : > { %v1092_v26 = vmul.f32 0.00012207031, %v432_v25 }
 0x26d   : > { %s775_s20 = spop %774  ;;  %v452_v29 = vmul.f32 %v1092_v26, %v1092_v26 }
 0x26e   : > { %v450_v27 = vstv %s775_s20  ;;  %s777_s22 = spop %776 }
 0x26f   : > { %v451_v28 = vmul.f32 0.00012207031, %v450_v27  ;;  %v485_v30 = vstv %s777_s22  ;;  %s188_s22 = sand.u32 1, %s892_s16  }
 0x270   : > { %v1096_v32 = vmul.f32 0.00012207031, %v485_v30  ;;  %s1204_s19 = scalar_lea.sflag [#allocation3], %s188_s22 }
 0x271   : > { %v453_v31 = vsub.f32 %v451_v28, %v452_v29  ;;  %v409_v28 = vld [vmem:[%s1248_s3 + $0x10] sm:$0xff] }
 0x272   : > { %v505_v43 = vmul.f32 %v1096_v32, %v1096_v32 }
 0x273   : > { %v454_v37 = vmax.f32 %v453_v31, 0.0  ;;  %s779_s23 = spop %778  ;;  %v411_v31 = vld [vmem:[%s1248_s3 + $0x20] sm:$0xff] }
 0x274   : > { %v503_v38 = vstv %s779_s23  ;;  %s746_s23 = sshll.u32 %s188_s22, 7 }
 0x275   : > { %v455_v41 = vadd.f32 1e-05, %v454_v37  ;;  %v504_v42 = vmul.f32 0.00012207031, %v503_v38  ;;  %s1161_s27 = scalar_lea.vmem [#allocation2], %s746_s23 }
 0x276   : > { %s680_s29 = sshll.u32 %s1161_s27, 4  ;;  %s1198_s29 = int_to_ptr.vmem [resolvable:$true] %s680_s29 }
 0x277   : > { %834 = vrsqrt.f32 %v455_v41  ;;  %v506_v44 = vsub.f32 %v504_v42, %v505_v43  ;;  %s838_s7 = scalar_lea.vmem %s1198_s29, 2048  ;;  %p845_p0 = scmp.lt.s32.totalorder %s1198_s29, %s843_s9 }
 0x278   : > { %p839_p11 = scmp.ne.s32.totalorder %s1198_s29, %s838_s7  ;;  %p846_p1 = scmp.lt.s32.totalorder %s844_s10, %s838_s7 }
 0x279   : > { %v507_v47 = vmax.f32 %v506_v44, 0.0 }
 0x27a   : > { %p840_p12 = pnand %p839_p11, %p969_p5  ;;  %p847_p2 = por %p846_p1, %p845_p0 }
 0x27b   : > { %v508_v48 = vadd.f32 1e-05, %v507_v47 }
 0x27c   : > { %p841_p13 = pneg %p840_p12 }
 0x27d   : > { %836 = vrsqrt.f32 %v508_v48 }
 0x27e   : > { %p848_p3 = pnand %p847_p2, %p841_p13 }
 0x281   : > { %v835_v52 = vpop.eup %834 }
 0x282   : > { %v458_v53 = vmul.f32 %v835_v52, %v400_v49  ;;  %v457_v54 = vmul.f32 %v835_v52, %v399_v50  ;;  %v460_v55 = vmul.f32 %v835_v52, %v402_v51  ;;  %v459_v60 = vmul.f32 %v835_v52, %v401_v56 }
 0x284   : > { %529 = vperm.xlu1 %823, %v458_v53   ;;  %524 = vperm.xlu0 %822, %v457_v54   ;;  %v462_v58 = vmul.f32 %v458_v53, %v1092_v26  ;;  %v464_v62 = vmul.f32 %v460_v55, %v1092_v26  ;;  %v461_v23 = vmul.f32 %v457_v54, %v1092_v26 }
 0x285   : > { %v463_v27 = vmul.f32 %v459_v60, %v1092_v26  ;;  %v413_v26 = vld [vmem:[%s1248_s3 + $0x30] sm:$0xff] }
 0x286   : > { %v466_v61 = vsub.f32 %v408_v57, %v462_v58  ;;  %v468_v3 = vsub.f32 %v410_v0, %v464_v62  ;;  %v465_v25 = vsub.f32 %v407_v24, %v461_v23 }
 0x287   : > { %v837_v63 = vpop.eup %836  ;;  %v467_v29 = vsub.f32 %v409_v28, %v463_v27 }
 0x288   : > { %534 = vperm.xlu1 %823, %v459_v60   ;;  %585 = vperm.xlu0 %822, %v466_v61   ;;  %v511_v2 = vmul.f32 %v837_v63, %v404_v59  ;;  %v513_v5 = vmul.f32 %v837_v63, %v406_v1  ;;  %v510_v13 = vmul.f32 %v837_v63, %v403_v7 }
 0x289   : > { %v512_v20 = vmul.f32 %v837_v63, %v405_v19 }
 0x28a   : > { %v515_v4 = vmul.f32 %v511_v2, %v1096_v32  ;;  %v517_v14 = vmul.f32 %v513_v5, %v1096_v32  ;;  %v514_v30 = vmul.f32 %v510_v13, %v1096_v32 }
 0x28b   : > { %v516_v38 = vmul.f32 %v512_v20, %v1096_v32 }
 0x28c   : > { %539 = vperm.xlu1 %823, %v460_v55   ;;  %595 = vperm.xlu0 %822, %v468_v3   ;;  %v519_v8 = vsub.f32 %v412_v6, %v515_v4  ;;  %v521_v18 = vsub.f32 %v414_v17, %v517_v14  ;;  %v518_v37 = vsub.f32 %v411_v31, %v514_v30 }
 0x28d   : > { %v520_v41 = vsub.f32 %v413_v26, %v516_v38 }
 0x290   : > { %605 = vperm.xlu0 %822, %v519_v8   ;;  %544 = vperm.xlu1 %823, %v510_v13  }
 0x294   : > { %615 = vperm.xlu0 %822, %v521_v18   ;;  %549 = vperm.xlu1 %823, %v511_v2  }
 0x298   : > { %554 = vperm.xlu1 %823, %v512_v20  }
 0x29c   : > { %559 = vperm.xlu1 %823, %v513_v5  }
 0x2a0   : > { %580 = vperm.xlu1 %823, %v465_v25  }
 0x2a4   : > { %590 = vperm.xlu1 %823, %v467_v29  }
 0x2a8   : > { %600 = vperm.xlu1 %823, %v518_v37  }
 0x2ac   : > { %610 = vperm.xlu1 %823, %v520_v41  }
 0x303   : > { %v525_v42 = vpop.permute.xlu0 %524  ;;  %v530_v43 = vpop.permute.xlu1 %529 }
 0x304   : > { %v564_v44 = vmul.f32 %v530_v43, %v1008_v15  ;;  %v565_v47 = vmul.f32 %v530_v43, %v1020_v21 }
 0x307   : > { %v586_v48 = vpop.permute.xlu0 %585  ;;  %v535_v49 = vpop.permute.xlu1 %534 }
 0x308   : > { %v620_v50 = vadd.f32 %v586_v48, %v564_v44  ;;  %v621_v32 = vadd.f32 %v586_v48, %v565_v47  ;;  %v566_v20 = vmul.f32 %v535_v49, %v1038_v34 }
 0x30a   : > { %v636_v51 = vmax.f32 %v620_v50, 0.0  ;;  %v637_v52 = vmax.f32 %v621_v32, 0.0 }
 0x30b   : > { %v540_v53 = vpop.permute.xlu1 %539  ;;  %v596_v54 = vpop.permute.xlu0 %595 }
 0x30c   : > { %652 = vst [vmem:[%s1161_s27 + $0x10] sm:$0xff] %v636_v51  ;;  %653 = vst [vmem:[%s1161_s27 + $0x18] sm:$0xff] %v637_v52  ;;  %v568_v15 = vmul.f32 %v540_v53, %v1050_v40  ;;  %v569_v21 = vmul.f32 %v540_v53, %v1062_v46 }
 0x30e   : > { %v624_v55 = vadd.f32 %v596_v54, %v568_v15  ;;  %v625_v56 = vadd.f32 %v596_v54, %v569_v21 }
 0x30f   : > { %v545_v57 = vpop.permute.xlu1 %544  ;;  %v606_v63 = vpop.permute.xlu0 %605 }
 0x310   : > { %v640_v58 = vmax.f32 %v624_v55, 0.0  ;;  %v641_v59 = vmax.f32 %v625_v56, 0.0  ;;  %v570_v25 = vmul.f32 %v545_v57, %v998_v10  ;;  %v571_v34 = vmul.f32 %v545_v57, %v1002_v12 }
 0x312   : > { %656 = vst [vmem:[%s1161_s27 + $0x30] sm:$0xff] %v640_v58  ;;  %657 = vst [vmem:[%s1161_s27 + $0x38] sm:$0xff] %v641_v59 }
 0x313   : > { %v550_v60 = vpop.permute.xlu1 %549  ;;  %v616_v6 = vpop.permute.xlu0 %615 }
 0x314   : > { %v572_v61 = vmul.f32 %v550_v60, %v1010_v16  ;;  %v573_v62 = vmul.f32 %v550_v60, %v1022_v22  ;;  %v562_v16 = vmul.f32 %v525_v42, %v996_v9  ;;  %v563_v22 = vmul.f32 %v525_v42, %v1000_v11 }
 0x316   : > { %v628_v0 = vadd.f32 %v606_v63, %v572_v61  ;;  %v629_v40 = vadd.f32 %v606_v63, %v573_v62 }
 0x317   : > { %v555_v1 = vpop.permute.xlu1 %554 }
 0x318   : > { %v644_v46 = vmax.f32 %v628_v0, 0.0  ;;  %v645_v2 = vmax.f32 %v629_v40, 0.0  ;;  %v574_v31 = vmul.f32 %v555_v1, %v1036_v33  ;;  %v575_v37 = vmul.f32 %v555_v1, %v1040_v35 }
 0x31a   : > { %660 = vst [vmem:[%s1161_s27 + $0x50] sm:$0xff] %v644_v46  ;;  %661 = vst [vmem:[%s1161_s27 + $0x58] sm:$0xff] %v645_v2 }
 0x31b   : > { %v560_v3 = vpop.permute.xlu1 %559 }
 0x31c   : > { %v576_v4 = vmul.f32 %v560_v3, %v1048_v39  ;;  %v577_v5 = vmul.f32 %v560_v3, %v1060_v45  ;;  %v567_v39 = vmul.f32 %v535_v49, %v1042_v36 }
 0x31e   : > { %v632_v7 = vadd.f32 %v616_v6, %v576_v4  ;;  %v633_v8 = vadd.f32 %v616_v6, %v577_v5 }
 0x31f   : > { %v581_v13 = vpop.permute.xlu1 %580 }
 0x320   : > { %v648_v14 = vmax.f32 %v632_v7, 0.0  ;;  %v649_v17 = vmax.f32 %v633_v8, 0.0  ;;  %v618_v18 = vadd.f32 %v581_v13, %v562_v16  ;;  %v619_v19 = vadd.f32 %v581_v13, %v563_v22 }
 0x322   : > { %664 = vst [vmem:[%s1161_s27 + $0x70] sm:$0xff] %v648_v14  ;;  %665 = vst [vmem:[%s1161_s27 + $0x78] sm:$0xff] %v649_v17  ;;  %v634_v9 = vmax.f32 %v618_v18, 0.0  ;;  %v635_v45 = vmax.f32 %v619_v19, 0.0 }
 0x323   : > { %v591_v23 = vpop.permute.xlu1 %590 }
 0x324   : > { %650 = vst [vmem:[%s1161_s27] sm:$0xff] %v634_v9  ;;  %651 = vst [vmem:[%s1161_s27 + $0x8] sm:$0xff] %v635_v45  ;;  %v622_v11 = vadd.f32 %v591_v23, %v566_v20  ;;  %v623_v24 = vadd.f32 %v591_v23, %v567_v39 }
 0x326   : > { %v638_v27 = vmax.f32 %v622_v11, 0.0  ;;  %v639_v36 = vmax.f32 %v623_v24, 0.0 }
 0x327   : > { %v601_v28 = vpop.permute.xlu1 %600 }
 0x328   : > { %654 = vst [vmem:[%s1161_s27 + $0x20] sm:$0xff] %v638_v27  ;;  %655 = vst [vmem:[%s1161_s27 + $0x28] sm:$0xff] %v639_v36  ;;  %v626_v29 = vadd.f32 %v601_v28, %v570_v25  ;;  %v627_v30 = vadd.f32 %v601_v28, %v571_v34 }
 0x32a   : > { %v642_v38 = vmax.f32 %v626_v29, 0.0  ;;  %v643_v10 = vmax.f32 %v627_v30, 0.0 }
 0x32b   : > { %v611_v12 = vpop.permute.xlu1 %610 }
 0x32c   : > { %658 = vst [vmem:[%s1161_s27 + $0x40] sm:$0xff] %v642_v38  ;;  %659 = vst [vmem:[%s1161_s27 + $0x48] sm:$0xff] %v643_v10  ;;  %v630_v26 = vadd.f32 %v611_v12, %v574_v31  ;;  %v631_v41 = vadd.f32 %v611_v12, %v575_v37 }
 0x32e   : > { %v646_v33 = vmax.f32 %v630_v26, 0.0  ;;  %v647_v35 = vmax.f32 %v631_v41, 0.0 }
 0x330   : > { %662 = vst [vmem:[%s1161_s27 + $0x60] sm:$0xff] %v646_v33  ;;  %663 = vst [vmem:[%s1161_s27 + $0x68] sm:$0xff] %v647_v35 }
 0x331   : > { %851 = shalt.err (!%p848_p3)
}
 0x332   : > { %s852_s11 = scalar_lea.hbm %s1196_s6, 2048  ;;  %s856_s14 = scalar_lea.hbm %s1249_s4, 4096 }
 0x333   : > { %p853_p4 = scmp.ne.s32.totalorder %s1196_s6, %s852_s11  ;;  %p857_p9 = scmp.lt.u32.totalorder %s1196_s6, %s1249_s4 }
 0x334   : > { %p858_p10 = scmp.lt.u32.totalorder %s856_s14, %s852_s11  ;;  %p860_p12 = scmp.lt.u32.totalorder %s852_s11, %s1196_s6 }
 0x335   : > { %p854_p7 = pnand %p853_p4, %p969_p5 }
 0x336   : > { %p859_p11 = por %p858_p10, %p857_p9 }
 0x337   : > { %p855_p8 = pneg %p854_p7 }
 0x338   : > { %p861_p13 = por %p860_p12, %p859_p11 }
 0x33a   : > { %p862_p0 = pnand %p861_p13, %p855_p8 }
 0x33c   : > { %865 = shalt.err (!%p862_p0)
}
 0x33d   : > { %s904_s23 = smov 256   ;;  %s905_s27 = smov 16  }
 0x33e   : > { %780 = dma.vmem_to_hbm [thread:$0]  (%p969_p5), %s1198_s29, 2048, %s1196_s6, %s1204_s19, %s904_s23, %s904_s23, %s905_s27  }
 0x33f PF: > { %p786_p1 = scmp.ge.s32.totalorder %s900_s18, 2  ;;  %s695_s28 = sand.u32 1, %s888_s15  }
 0x340   : > { %s696_s30 = scalar_lea.sflag [#allocation3], %s695_s28 }
 0x341   : > { %p783_p2 = pnand %p786_p1, %p973_p6 }
 0x343   : > { %883 = dma.done.wait (!%p783_p2), %s696_s30, 2048  }
 0x344   : > { %885 = vsyncadd (!%p783_p2), %s696_s30, 4294965248  ;;  %p14_p3 = scmp.ge.s32.totalorder %s956_s21, 4   ;;  %s1252_s15 = smov %s892_s16 }
 0x345   : > { %s1253_s16 = smov %s896_s17  ;;  %s1254_s17 = smov %s967_s24 }
 0x346   : > { %s1255_s18 = smov %s956_s21  ;;  %16 = sbr.rel (!%p14_p3) target bundleno = 3 (0x3), region = 71 }
 0x34d   :  { %701 = vsyncpa [#allocation3], 1 }
 0x34e   :  { %703 = vsyncpa [#allocation3 + $0x1], 1 }

</bundles_post_ra>
